<compile_context>
chip_gen: v6e
topology: v6e:2x2x1
jax: 0.10.0
libtpu: 0.0.40
codegen_flags: <defaults>
</compile_context>

<pallas_src>
import math

import jax
import jax.numpy as jnp
import numpy as np
from jax.experimental import pallas as pl
from jax.experimental.pallas import tpu as pltpu


# ---------------------------------------------------------------------------
# Kernel: one (1, C_in, l_tile) NCW block -> (1, C_out, l_tile) block.
# ---------------------------------------------------------------------------
def _affine_kernel(x_ref, w_ref, b_ref, o_ref):
    # x_ref: (1, C_in, l_tile)  lane-dense input block
    # w_ref: (C_out, C_in)      folded effective weight (VMEM-resident)
    # b_ref: (C_out, 1)         folded effective bias (broadcasts along lanes)
    y = jnp.dot(w_ref[...], x_ref[0], preferred_element_type=jnp.float32)
    o_ref[0] = (y + b_ref[...]).astype(o_ref.dtype)


# ---------------------------------------------------------------------------
# Wrapper-level helpers.
# ---------------------------------------------------------------------------
def _round_up(x, m):
    return ((x + m - 1) // m) * m


def _fold_affine(weights, biases, skips, hidden_dim, in_dim):
    """Fold the purely-affine layer stack into a single (W_eff, b_eff)."""
    assert 0 not in skips, "skip at layer 0 is ill-formed in the original module"
    A = jnp.eye(in_dim, dtype=jnp.float32)           # running map: h = A @ x0 + c
    c = jnp.zeros((in_dim,), dtype=jnp.float32)
    for i, (w, b) in enumerate(zip(weights, biases)):
        w = jnp.asarray(w, jnp.float32)
        b = jnp.asarray(b, jnp.float32)
        if i in skips:
            # torch.cat([h, x], dim=1): first hidden_dim columns act on h,
            # the remaining in_dim columns act on the original input x0.
            assert A.shape[0] == hidden_dim and w.shape[1] == hidden_dim + in_dim, \
                "skip layer input width mismatch"
            wh, wx = w[:, :hidden_dim], w[:, hidden_dim:]
            A = wh @ A + wx
            c = wh @ c + b
        else:
            assert w.shape[1] == A.shape[0], "layer input width mismatch"
            A = w @ A
            c = w @ c + b
    return A, c                                       # (out_dim, in_dim), (out_dim,)


def _choose_tiling(N, L, c_in, c_out,
                   block_budget_bytes=12 << 20, max_l_tile=32768):
    """Pick a lane tile (multiple of 128) and the padded length it divides.

    Budget accounts for the double-buffered f32 input + output blocks; it fits
    v5e's 16 MiB default scoped VMEM and leaves ample headroom on v7x (64 MiB).
    """
    bytes_per_lane = 4 * (c_in + c_out) * 2            # f32 in+out, double-buffered
    cap = max(128, min(max_l_tile,
                       (block_budget_bytes // bytes_per_lane) // 128 * 128))
    l_tile = min(cap, _round_up(L, 128))
    l_pad = _round_up(L, l_tile)
    n_lt = l_pad // l_tile
    # v7x has 2 TensorCores: keep the total parallel step count even if we can.
    if (N * n_lt) % 2 == 1 and N * n_lt > 1 and l_tile >= 256:
        l_tile //= 2
        l_pad = _round_up(L, l_tile)
        n_lt = l_pad // l_tile
    return l_tile, l_pad, n_lt


def mlp_pallas(x, weights, biases, skips=(), hidden_dim=None):
    """Forward pass of MLP (EqualConv1d(k=1) stack + skip-concats, no activation).

    x: (N, C_in, L) in PyTorch NCW layout.
    weights[i]: (C_out_i, C_in_i) with the EqualConv1d 1/sqrt(fan_in) scale folded in.
    biases[i]:  (C_out_i,).
    Returns (N, out_dim, L).
    """
    N, C_in, L = x.shape
    out_dim = weights[-1].shape[0]
    if hidden_dim is None:
        hidden_dim = weights[0].shape[0]
    skips = tuple(skips)

    # The whole stack is affine -> fold it to a single matmul (exact, trace-time tiny).
    w_eff, b_eff = _fold_affine(weights, biases, skips, hidden_dim, C_in)
    w_eff = w_eff.astype(jnp.float32)                  # (out_dim, C_in)
    b_eff = b_eff.reshape(-1, 1).astype(jnp.float32)   # (out_dim, 1), lane-broadcast

    l_tile, l_pad, n_lt = _choose_tiling(N, L, C_in, out_dim)
    if l_pad != L:
        # Zero-pad L so all stores stay unmasked and lane-dense; slice back below.
        x = jnp.pad(x, ((0, 0), (0, 0), (0, l_pad - L)))

    # Explicit VMEM limit: double-buffered blocks + resident weights + headroom.
    block_bytes = 2 * 4 * (C_in + out_dim) * l_tile
    vmem_limit = int(min(60 << 20, max(24 << 20, 2 * block_bytes)))

    out = pl.pallas_call(
        _affine_kernel,
        out_shape=jax.ShapeDtypeStruct((N, out_dim, l_pad), x.dtype),
        grid=(N, n_lt),
        in_specs=[
            pl.BlockSpec((1, C_in, l_tile), lambda n, li: (n, 0, li)),
            pl.BlockSpec((out_dim, C_in), lambda n, li: (0, 0)),   # VMEM-resident
            pl.BlockSpec((out_dim, 1), lambda n, li: (0, 0)),      # VMEM-resident
        ],
        out_specs=pl.BlockSpec((1, out_dim, l_tile), lambda n, li: (n, 0, li)),
        compiler_params=pltpu.CompilerParams(
            dimension_semantics=("parallel", "parallel"),
            vmem_limit_bytes=vmem_limit),
    )(x, w_eff, b_eff)

    return out[:, :, :L] if l_pad != L else out


# ---------------------------------------------------------------------------
# Deterministic parameter construction + pure-JAX reference (layered).
# ---------------------------------------------------------------------------
def init_mlp_params(key, in_dim, hidden_dim, out_dim, num_layers=3, skips=()):
    """EqualConv1d parameters: weights (C_out, C_in) with the 1/sqrt(C_in*1)
    equal-lr scale folded in, biases (C_out,)."""
    dims_in = [in_dim]
    for i in range(1, num_layers - 1):
        dims_in.append(in_dim + hidden_dim if i in skips else hidden_dim)
    dims_in.append(hidden_dim)
    dims_out = [hidden_dim] * (num_layers - 1) + [out_dim]
    assert len(dims_in) == len(dims_out) == num_layers

    weights, biases = [], []
    for ci, co in zip(dims_in, dims_out):
        key, kw, kb = jax.random.split(key, 3)
        w = jax.random.normal(kw, (co, ci), dtype=jnp.float32)
        weights.append(w * (1.0 / math.sqrt(ci * 1)))
        biases.append(0.1 * jax.random.normal(kb, (co,), dtype=jnp.float32))
    return weights, biases


def mlp_reference(x, weights, biases, skips=()):
    """Layer-by-layer pure-JAX reference of the PyTorch forward (NCW layout)."""
    h = x
    x0 = x
    for i, (w, b) in enumerate(zip(weights, biases)):
        if i in skips:
            h = jnp.concatenate([h, x0], axis=1)
        h = jnp.einsum("oc,ncl->nol", w, h) + b.reshape(1, -1, 1)
    return h


if __name__ == "__main__":
    key = jax.random.PRNGKey(0)
    ok = True
    # (N, in_dim, L, hidden_dim, out_dim, num_layers, skips)
    configs = [
        (2, 4, 16, 32, 3, 3, ()),      # tiny L, padded to one 128-lane block
        (2, 4, 16, 32, 3, 3, (1,)),    # skip-concat path
        (2, 4, 200, 32, 3, 4, (2,)),   # non-128-multiple L -> pad + slice back
        (3, 4, 256, 32, 3, 3, ()),     # odd step count -> even-grid heuristic
    ]
    for (N, in_dim, L, hidden_dim, out_dim, num_layers, skips) in configs:
        key, kx, kp = jax.random.split(key, 3)
        x = jax.random.normal(kx, (N, in_dim, L), dtype=jnp.float32)
        weights, biases = init_mlp_params(kp, in_dim, hidden_dim, out_dim,
                                          num_layers=num_layers, skips=skips)
        out = mlp_pallas(x, weights, biases, skips=skips, hidden_dim=hidden_dim)
        out = jax.block_until_ready(out)
        assert out.shape == (N, out_dim, L), out.shape
        ref = mlp_reference(x, weights, biases, skips=skips)
        ok = ok and bool(np.allclose(np.asarray(out), np.asarray(ref),
                                     rtol=2e-3, atol=2e-3))

    if ok:
        print("KERNEL_OK")
</pallas_src>

<mosaic_0001>
module attributes {stable_mosaic.version = 11 : i64} {
  func.func @_affine_kernel(%arg0: i32, %arg1: i32, %arg2: memref<1x4x128xf32, #tpu.memory_space<vmem>>, %arg3: memref<3x4xf32, #tpu.memory_space<vmem>>, %arg4: memref<3x1xf32, #tpu.memory_space<vmem>>, %arg5: memref<1x3x128xf32, #tpu.memory_space<vmem>>) attributes {dimension_semantics = [#tpu.dimension_semantics<parallel>, #tpu.dimension_semantics<parallel>], iteration_bounds = array<i64: 2, 1>, scalar_prefetch = 0 : i64, scratch_operands = 0 : i64, tpu.core_type = #tpu.core_type<tc>, window_params = [{transform_indices = @transform_0, window_bounds = array<i64: 1, 4, 128>}, {pipeline_mode = #tpu.pipeline_mode<synchronous>, transform_indices = @transform_1, window_bounds = array<i64: 3, 4>}, {pipeline_mode = #tpu.pipeline_mode<synchronous>, transform_indices = @transform_2, window_bounds = array<i64: 3, 1>}, {transform_indices = @transform_3, window_bounds = array<i64: 1, 3, 128>}]} {
    %c0 = arith.constant 0 : index
    %c0_0 = arith.constant 0 : index
    %0 = vector.load %arg3[%c0, %c0_0] : memref<3x4xf32, #tpu.memory_space<vmem>>, vector<3x4xf32>
    %c0_1 = arith.constant 0 : index
    %c0_2 = arith.constant 0 : index
    %c0_3 = arith.constant 0 : index
    %1 = vector.load %arg2[%c0_1, %c0_2, %c0_3] : memref<1x4x128xf32, #tpu.memory_space<vmem>>, vector<1x4x128xf32>
    %2 = vector.shape_cast %1 : vector<1x4x128xf32> to vector<4x128xf32>
    %cst = arith.constant dense<0.000000e+00> : vector<3x128xf32>
    %3 = tpu.matmul %0, %2, %cst {dimension_numbers = #tpu.dot_dimension_numbers<[1], [0], [0], [1], [0, 0, 1, 1], [], []>} : vector<3x4xf32>, vector<4x128xf32>, vector<3x128xf32> -> vector<3x128xf32>
    %c0_4 = arith.constant 0 : index
    %c0_5 = arith.constant 0 : index
    %4 = vector.load %arg4[%c0_4, %c0_5] : memref<3x1xf32, #tpu.memory_space<vmem>>, vector<3x1xf32>
    %5 = vector.broadcast %4 : vector<3x1xf32> to vector<3x128xf32>
    %6 = arith.addf %3, %5 : vector<3x128xf32>
    %c0_6 = arith.constant 0 : index
    %c0_7 = arith.constant 0 : index
    %c0_8 = arith.constant 0 : index
    %7 = vector.load %arg5[%c0_6, %c0_7, %c0_8] : memref<1x3x128xf32, #tpu.memory_space<vmem>>, vector<1x3x128xf32>
    %8 = vector.shape_cast %7 : vector<1x3x128xf32> to vector<3x128xf32>
    %9 = vector.shape_cast %6 : vector<3x128xf32> to vector<1x3x128xf32>
    tpu.vector_store %arg5[%c0_6, %c0_7, %c0_8], %9 {strides = array<i32>} : memref<1x3x128xf32, #tpu.memory_space<vmem>>, vector<1x3x128xf32>,
    return
  }
  func.func @transform_0(%arg0: i32, %arg1: i32) -> (i32, i32, i32) {
    %c0_i32 = arith.constant 0 : i32
    %c0_i32_0 = arith.constant 0 : i32
    return %arg0, %c0_i32, %arg1 : i32, i32, i32
  }
  func.func @transform_1(%arg0: i32, %arg1: i32) -> (i32, i32) {
    %c0_i32 = arith.constant 0 : i32
    %c0_i32_0 = arith.constant 0 : i32
    %c0_i32_1 = arith.constant 0 : i32
    return %c0_i32, %c0_i32_0 : i32, i32
  }
  func.func @transform_2(%arg0: i32, %arg1: i32) -> (i32, i32) {
    %c0_i32 = arith.constant 0 : i32
    %c0_i32_0 = arith.constant 0 : i32
    %c0_i32_1 = arith.constant 0 : i32
    return %c0_i32, %c0_i32_0 : i32, i32
  }
  func.func @transform_3(%arg0: i32, %arg1: i32) -> (i32, i32, i32) {
    %c0_i32 = arith.constant 0 : i32
    %c0_i32_0 = arith.constant 0 : i32
    return %arg0, %c0_i32, %arg1 : i32, i32, i32
  }
}

</mosaic_0001>

<bundles_post_ra>
// kernel: tpu_custom_call.1
= control target key start
LH: loop header
LB: loop body
LE: loop exit
PB: predicated region body
PF: predicated region fallthrough
CT: control target
= control target key end

     0   :  { %8 = vsyncpa [#allocation3], 0  ;;  %s669_s0 = inlined_call_operand.hbm [shape: f32[2,4,128], index: 0, kind: input, shape index: {}]   ;;  %s670_s1 = inlined_call_operand.vmem [shape: f32[3,4], index: 1, kind: input, shape index: {}]   ;;  %s671_s2 = inlined_call_operand.vmem [shape: f32[3,1], index: 2, kind: input, shape index: {}]   ;;  %s672_s3 = inlined_call_operand.vmem [shape: f32[2,3,128], index: 3, kind: output, shape index: {}]  }
   0x1   :  { %10 = vsyncpa [#allocation3 + $0x1], 0  ;;  %s563_s12 = smov 0   ;;  %s565_s13 = smov 0  }
   0x2   :  { %s567_s14 = smov 0   ;;  %s569_s15 = smov 0  }
   0x3   :  { %s571_s16 = smov 0   ;;  %s573_s17 = smov 0  }
   0x4 LB: > { %s380_s18 = sadd.s32 4294967295, %s537_s17   ;;  %s28_s19 = sadd.s32 1, %s533_s16  ;;  %s537_s17 = sphi %s573_s17, %s16_s17   ;;  %s533_s16 = sphi %s571_s16, %s680_s16   ;;  %s529_s15 = sphi %s569_s15, %s679_s15   ;;  %s525_s14 = sphi %s567_s14, %s678_s14   ;;  %s521_s13 = sphi %s565_s13, %s677_s13   ;;  %s517_s12 = sphi %s563_s12, %s676_s12  }
   0x5   : > { %p30_p0 = scmp.ge.s32.totalorder %s28_s19, 2  ;;  %s37_s20 = sadd.s32 1, %s525_s14 }
   0x6   : > { %p44_p1 = scmp.ne.s32.totalorder %s525_s14, %s521_s13  ;;  %p45_p2 = scmp.eq.s32.totalorder %s537_s17, 0 }
   0x7   : > { %s682_s19 = smov (%p30_p0, %s28_s19), 0  ;;  %p50_p4 = scmp.ne.s32.totalorder %s521_s13, %s517_s12 }
   0x8   : > { %p599_p3 = por %p45_p2, %p44_p1  ;;  %s32_s22 = ssub.s32 %s533_s16, %s682_s19 }
   0x9   : > { %p51_p5 = scmp.eq.s32.totalorder %s380_s18, 0  ;;  %p35_p6 = scmp.eq.s32.totalorder %s32_s22, 0 }
   0xa   : > { %p406_p8 = scmp.lt.s32.totalorder %s537_s17, 2  ;;  %s150_s25 = sand.u32 1, %s525_s14  }
   0xb   : > { %p606_p7 = por %p51_p5, %p50_p4  ;;  %s385_s26 = sshll.u32 %s533_s16, 6 }
   0xc   : > { %s612_s24 = scalar_select %p35_p6, %s525_s14, %s37_s20  }
   0xd   : > { %s384_s27 = sshll.u32 %s150_s25, 2  ;;  %s160_s30 = scalar_lea.hbm %s669_s0, %s385_s26 }
   0xe   : > { %s154_s4 = scalar_lea.vmem [#allocation2], %s384_s27  ;;  %p621_p9 = pnand %p406_p8, %p599_p3 }
   0xf   : > { %s162_s5 = sshll.u32 %s154_s4, 4  ;;  %p386_p10 = scmp.ge.s32.totalorder %s537_s17, 1  ;;  %s163_s5 = int_to_ptr.vmem [resolvable:$true] %s162_s5 }
  0x10   : > { %p167_p11 = scmp.lt.s32.totalorder %s537_s17, 3  ;;  %s151_s7 = scalar_lea.sflag [#allocation3], %s150_s25 }
  0x11   : > { %p461_p12 = pneg %p621_p9  ;;  %s472_s8 = scalar_lea.vmem %s163_s5, 64 }
  0x12   : > { %p473_p13 = scmp.ne.s32.totalorder %s163_s5, %s472_s8  ;;  %s539_s9 = smov [#allocation2]  }
  0x13   : > { %s477_s10 = sshll.u32 %s539_s9, 4  ;;  %s478_s10 = int_to_ptr.vmem [resolvable:$false] %s477_s10 }
  0x14   : > { %p475_p0 = pnand %p473_p13, %p461_p12  ;;  %s479_s11 = scalar_lea.vmem %s478_s10, 128 }
  0x15   : > { %p480_p2 = scmp.lt.s32.totalorder %s163_s5, %s478_s10  ;;  %p481_p3 = scmp.lt.s32.totalorder %s479_s11, %s472_s8 }
  0x16   : > { %p476_p1 = pneg %p475_p0 }
  0x17   : > { %p482_p4 = por %p481_p3, %p480_p2 }
  0x19   : > { %p483_p5 = pnand %p482_p4, %p476_p1 }
  0x1b   : > { %486 = shalt.err (!%p483_p5)
}
  0x1c   : > { %405 = dma.hbm_to_vmem [thread:$0]  (!%p621_p9), %s160_s30, 64, %s163_s5, %s151_s7  }
  0x1d   : > { %p168_p6 = pnand %p386_p10, %p167_p11 }
  0x1e   : > { %s173_s12 = sand.u32 (!%p168_p6), 1, %s521_s13  }
  0x1f   : > { %171 = sbr.rel (%p168_p6) target bundleno = 236 (0xec), region = 32  ;;  %s387_s18 = sshll.u32 (!%p168_p6), %s173_s12, 2 }
  0x20   : > { %s174_s20 = scalar_lea.sflag (!%p168_p6), [#allocation3], %s173_s12  ;;  %s177_s21 = scalar_lea.vmem (!%p168_p6), [#allocation2], %s387_s18 }
  0x24   : > { %512 = dma.done.wait (%p606_p7), %s174_s20, 64  }
  0x25   : > { %514 = vsyncadd (%p606_p7), %s174_s20, 4294967232  ;;  %v540_v0 = vmov 0.0   ;;  %vm541_vm0 = vmmov 0   ;;  %v542_v1 = vmov 0   ;;  %vm221_vm1 = vcmask 1043456   ;;  %p202_p7 = scmp.lt.s32.totalorder %s529_s15, 1 }
  0x26   : > { %395 = vmatprep.subr.mxu0 %v540_v0  ;;  %397 = vmatprep.mubr.msk.f32.mxu0 %vm541_vm0, %v540_v0  ;;  %vm217_vm2 = vcmask 31744   ;;  %v210_v2 = vld [vmem:[%s177_s21] sm:$0xf] }
  0x27   : > { %458 = vset.pattern.permute.xlu0 %v542_v1  ;;  %v209_v3 = vld [vmem:[%s670_s1] sm:$0x7]  ;;  %396 = vmatpush3.msk.msra.mxu0 %vm221_vm1, %v210_v2  ;;  %s684_s15 = smov (!%p202_p7, %s529_s15), 1 }
  0x28   : > { %v211_v4 = vld [vmem:[%s671_s2] sm:$0x7]  ;;  %398 = vmatmul.mubr.msk.f32.vlgmr.msra.gmra.mxu0 %vm217_vm2, %v209_v3  ;;  %s388_s23 = sshll.u32 %s684_s15, 2 }
  0x29   : > { %214 = vperm.xlu0 %458, %v211_v4   ;;  %s208_s30 = scalar_lea.vmem %s672_s3, %s388_s23 }
  0xa4   : > { %v215_v5 = vpop.permute.xlu0 %214 }
  0xe8   : > { %v291_v6 = vpop.f32.mrf.mxu0 }
  0xe9   : > { %v292_v7 = vadd.f32 %v291_v6, %v215_v5 }
  0xea   : > { %v399_v8 = vpop.f32.mrf.mxu0 }
  0xeb   : > { %295 = vst [vmem:[%s208_s30] sm:$0x7] %v292_v7 }
  0xec PF: > { %s16_s17 = sadd.s32 1, %s537_s17   ;;  %s676_s12 = smov %s521_s13 }
  0xed   : > { %p13_p8 = scmp.ge.s32.totalorder %s16_s17, 4   ;;  %s677_s13 = smov %s525_s14 }
  0xee   : > { %s678_s14 = smov %s612_s24  ;;  %s679_s15 = smov %s533_s16 }
  0xef   : > { %s680_s16 = smov %s682_s19  ;;  %15 = sbr.rel (!%p13_p8) target bundleno = 4 (0x4), region = 72 }
  0xf4   :  { %321 = vsyncpa [#allocation3], 1 }
  0xf5   :  { %323 = vsyncpa [#allocation3 + $0x1], 1 }

</bundles_post_ra>
